<compile_context>
chip_gen: v6e
topology: v6e:2x2x1
jax: 0.10.0
libtpu: 0.0.40
codegen_flags: <defaults>
</compile_context>

<pallas_src>
import functools

import jax
import jax.numpy as jnp
import numpy as np
from jax.experimental import pallas as pl
from jax.experimental.pallas import tpu as pltpu


# ----------------------------------------------------------------------------
# Fused kernel: base CE + OKD (KL) + classifier diversification
# ----------------------------------------------------------------------------
def _fused_loss_kernel(logits_ref, tgt_ref, w_ref, out_ref, *,
                       num_experts, batch_size, temperature):
    """Inputs:
         logits_ref : [E*B, C]  expert-major flattened expert logits
         tgt_ref    : [E*B, 1]  int32 target class per (expert, batch) row
         w_ref      : [E, C, D] stacked classifier weights
       Output (SMEM):
         out_ref    : [3] f32   -> [base_loss, okd_loss, cd_loss]
    """
    E = num_experts
    B = batch_size
    inv_T = jnp.float32(1.0 / temperature)

    logits = logits_ref[...].astype(jnp.float32)                    # [E*B, C]
    EB, C = logits.shape

    # ---- base cross entropy over all (expert, batch) rows -------------------
    tgt = tgt_ref[...]                                              # [E*B, 1]
    col = jax.lax.broadcasted_iota(jnp.int32, (EB, C), 1)
    picked = jnp.sum(jnp.where(col == tgt, logits, 0.0),
                     axis=-1, keepdims=True)                        # [E*B, 1]

    m = jnp.max(logits, axis=-1, keepdims=True)                     # [E*B, 1]
    d = logits - m
    lse = m + jnp.log(jnp.sum(jnp.exp(d), axis=-1, keepdims=True))  # [E*B, 1]
    base_loss = (jnp.sum(lse) - jnp.sum(picked)) / EB

    # ---- temperature-scaled per-expert log-partition (reuse the same max) ---
    # max(x / T) == max(x) / T for T > 0 -> no second max-reduce.
    slse = m * inv_T + jnp.log(
        jnp.sum(jnp.exp(d * inv_T), axis=-1, keepdims=True))        # [E*B, 1]

    # ---- expert-major slab sums: contiguous VPU adds, no XLU reshuffle ------
    acc = logits[0:B, :]
    sum_slse = slse[0:B, :]
    for e in range(1, E):
        acc = acc + logits[e * B:(e + 1) * B, :]
        sum_slse = sum_slse + slse[e * B:(e + 1) * B, :]
    ens = acc * (inv_T / E)                                         # [B, C]

    # ---- OKD KL, algebraically collapsed -------------------------------------
    #   sum_e KL(p_ens || p_e)(b)
    #     = sum_c p_ens * (E*log p_ens - sum_e log p_e)
    #     = sum_e LSE(s_e[b]) - E * LSE(mean_e s_e[b])     (class terms cancel)
    em = jnp.max(ens, axis=-1, keepdims=True)                       # [B, 1]
    ens_lse = em + jnp.log(jnp.sum(jnp.exp(ens - em),
                                   axis=-1, keepdims=True))         # [B, 1]
    okd_loss = (jnp.sum(sum_slse) - E * jnp.sum(ens_lse)) / (B * E)

    # ---- classifier diversification: unrolled per-pair VPU loop --------------
    w_all = w_ref[...].astype(jnp.float32)                          # [E, C, D]
    ss = jnp.sum(w_all * w_all, axis=-1, keepdims=True)             # [E, C, 1]
    # rsqrt(max(ss, eps^2)) == 1 / max(||w||, eps)   (F.normalize, eps=1e-12)
    wn = w_all * jax.lax.rsqrt(jnp.maximum(ss, 1e-24))              # [E, C, D]

    num_pairs = E * (E - 1) // 2
    cd_total = jnp.float32(0.0)
    for i in range(E):
        for j in range(i + 1, E):
            cos_ij = jnp.sum(wn[i] * wn[j], axis=-1, keepdims=True)  # [C, 1]
            cd_total = cd_total + jnp.sum(jnp.abs(cos_ij))
    cd_loss = (cd_total / (C * num_pairs)) if num_pairs > 0 else jnp.float32(0.0)

    out_ref[0] = base_loss
    out_ref[1] = okd_loss
    out_ref[2] = cd_loss


# ----------------------------------------------------------------------------
# Wrapper: EnhancedCCNetLoss.forward
# ----------------------------------------------------------------------------
def enhanced_ccnet_loss(expert_logits, expert_weights, targets,
                        lambda_okd=1.0, lambda_cd=5e-08, temperature=3.0):
    B, E, C = expert_logits.shape
    assert len(expert_weights) == E
    assert temperature > 0.0, "temperature must be > 0"

    # Expert-major flat view: lane axis stays C, and all per-expert reductions
    # inside the kernel become contiguous slab adds (one tiny upstream
    # transpose, no in-kernel reshape copy).
    logits_em = jnp.transpose(expert_logits, (1, 0, 2)).reshape(E * B, C)
    # Target class id per (expert, batch) row.
    tgt_em = jnp.tile(targets.astype(jnp.int32), E).reshape(E * B, 1)
    # Single stacked weight slab -> one pipelined DMA instead of E tiny ones.
    w_all = jnp.stack(expert_weights, axis=0)                        # [E, C, D]

    kernel = functools.partial(_fused_loss_kernel, num_experts=E,
                               batch_size=B, temperature=float(temperature))

    # NOTE: gridless single block is right at these KB-scale sizes.  For
    # production-scale B, tile the batch on a grid writing per-tile PARTIAL
    # sums reduced in JAX, mark the axis "parallel" (2 TCs on v7x), raise
    # vmem_limit_bytes toward the scoped limit, and size tiles for v7x's
    # 64 MiB VMEM.
    out = pl.pallas_call(
        kernel,
        out_shape=jax.ShapeDtypeStruct((3,), jnp.float32),
        in_specs=[pl.BlockSpec(memory_space=pltpu.MemorySpace.VMEM)] * 3,
        out_specs=pl.BlockSpec(memory_space=pltpu.MemorySpace.SMEM),
    )(logits_em, tgt_em, w_all)

    base_loss, okd_loss, cd_loss = out[0], out[1], out[2]
    total_loss = base_loss + lambda_okd * okd_loss + lambda_cd * cd_loss
    # NOTE: matches the original module — the KL term is NOT scaled by T**2.
    return {'total_loss': total_loss, 'base_loss': base_loss,
            'okd_loss': okd_loss, 'cd_loss': cd_loss}


# ----------------------------------------------------------------------------
# Pure-JAX reference (silent correctness check, full/unsimplified math)
# ----------------------------------------------------------------------------
def _reference(logits, w_stacked, targets, lambda_okd, lambda_cd, T):
    B, E, C = logits.shape
    lp = jax.nn.log_softmax(logits, axis=-1)
    onehot = jax.nn.one_hot(targets, C, dtype=jnp.float32)
    base = -jnp.mean(jnp.sum(lp * onehot[:, None, :], axis=-1))

    scaled = logits / T
    ens_lp = jax.nn.log_softmax(jnp.mean(scaled, axis=1), axis=-1)
    ens_p = jnp.exp(ens_lp)
    exp_lp = jax.nn.log_softmax(scaled, axis=-1)
    okd = jnp.sum(ens_p[:, None, :] * (ens_lp[:, None, :] - exp_lp)) / (B * E)

    wn = w_stacked / jnp.maximum(
        jnp.linalg.norm(w_stacked, axis=-1, keepdims=True), 1e-12)
    total, cnt = 0.0, 0
    for i in range(E):
        for j in range(i + 1, E):
            total += jnp.mean(jnp.abs(jnp.sum(wn[i] * wn[j], axis=-1)))
            cnt += 1
    cd = total / cnt
    return base + lambda_okd * okd + lambda_cd * cd, base, okd, cd


if __name__ == "__main__":
    B, E, C, D = 8, 4, 16, 32   # batch, experts, classes, feature dim
    key = jax.random.PRNGKey(0)
    k_logits, k_tgt, k_w = jax.random.split(key, 3)

    expert_logits = jax.random.normal(k_logits, (B, E, C), dtype=jnp.float32)
    targets = jax.random.randint(k_tgt, (B,), 0, C, dtype=jnp.int32)
    w_keys = jax.random.split(k_w, E)
    expert_weights = [0.1 * jax.random.normal(w_keys[i], (C, D), dtype=jnp.float32)
                      for i in range(E)]

    out = enhanced_ccnet_loss(expert_logits, expert_weights, targets)
    out = jax.tree_util.tree_map(jax.block_until_ready, out)

    # silent sanity check against pure-JAX reference
    ref_total, ref_base, ref_okd, ref_cd = _reference(
        expert_logits, jnp.stack(expert_weights, 0), targets, 1.0, 5e-08, 3.0)
    np.testing.assert_allclose(np.array(out['base_loss']), np.array(ref_base),
                               rtol=1e-4, atol=1e-5)
    np.testing.assert_allclose(np.array(out['okd_loss']), np.array(ref_okd),
                               rtol=1e-4, atol=1e-5)
    np.testing.assert_allclose(np.array(out['cd_loss']), np.array(ref_cd),
                               rtol=1e-4, atol=1e-5)
    np.testing.assert_allclose(np.array(out['total_loss']), np.array(ref_total),
                               rtol=1e-4, atol=1e-5)

    print("KERNEL_OK")
</pallas_src>

<mosaic_0001>
module attributes {stable_mosaic.version = 11 : i64} {
  func.func @_fused_loss_kernel(%arg0: memref<32x16xf32, #tpu.memory_space<vmem>>, %arg1: memref<32x1xi32, #tpu.memory_space<vmem>>, %arg2: memref<4x16x32xf32, #tpu.memory_space<vmem>>, %arg3: memref<3xf32, #tpu.memory_space<smem>>) attributes {dimension_semantics = [], scalar_prefetch = 0 : i64, scratch_operands = 0 : i64, tpu.core_type = #tpu.core_type<tc>} {
    %c0 = arith.constant 0 : index
    %c0_0 = arith.constant 0 : index
    %0 = vector.load %arg0[%c0, %c0_0] : memref<32x16xf32, #tpu.memory_space<vmem>>, vector<32x16xf32>
    %c0_1 = arith.constant 0 : index
    %c0_2 = arith.constant 0 : index
    %1 = vector.load %arg1[%c0_1, %c0_2] : memref<32x1xi32, #tpu.memory_space<vmem>>, vector<32x1xi32>
    %2 = tpu.iota {dimensions = array<i32: 1>} : vector<32x16xi32>
    %3 = vector.broadcast %1 : vector<32x1xi32> to vector<32x16xi32>
    %4 = arith.cmpi eq, %2, %3 : vector<32x16xi32>
    %cst = arith.constant 0.000000e+00 : f32
    %5 = vector.broadcast %cst : f32 to vector<32x16xf32>
    %6 = arith.select %4, %0, %5 : vector<32x16xi1>, vector<32x16xf32>
    %cst_3 = arith.constant dense<0.000000e+00> : vector<32xf32>
    %7 = vector.multi_reduction <add>, %6, %cst_3 [1] : vector<32x16xf32> to vector<32xf32>
    %8 = vector.shape_cast %7 : vector<32xf32> to vector<32x1xf32>
    %cst_4 = arith.constant dense<0xFF800000> : vector<32xf32>
    %9 = vector.multi_reduction <maximumf>, %0, %cst_4 [1] : vector<32x16xf32> to vector<32xf32>
    %10 = vector.shape_cast %9 : vector<32xf32> to vector<32x1xf32>
    %11 = vector.broadcast %10 : vector<32x1xf32> to vector<32x16xf32>
    %12 = arith.subf %0, %11 : vector<32x16xf32>
    %13 = math.exp %12 : vector<32x16xf32>
    %cst_5 = arith.constant dense<0.000000e+00> : vector<32xf32>
    %14 = vector.multi_reduction <add>, %13, %cst_5 [1] : vector<32x16xf32> to vector<32xf32>
    %15 = vector.shape_cast %14 : vector<32xf32> to vector<32x1xf32>
    %16 = math.log %15 : vector<32x1xf32>
    %17 = arith.addf %10, %16 : vector<32x1xf32>
    %18 = vector.shape_cast %17 : vector<32x1xf32> to vector<1x32x1xf32>
    %cst_6 = arith.constant dense<0.000000e+00> : vector<1xf32>
    %19 = vector.multi_reduction <add>, %18, %cst_6 [1, 2] : vector<1x32x1xf32> to vector<1xf32>
    %20 = vector.shape_cast %19 : vector<1xf32> to vector<1x1x1xf32>
    %21 = vector.extract %20[0, 0, 0] : f32 from vector<1x1x1xf32>
    %22 = vector.shape_cast %8 : vector<32x1xf32> to vector<1x32x1xf32>
    %cst_7 = arith.constant dense<0.000000e+00> : vector<1xf32>
    %23 = vector.multi_reduction <add>, %22, %cst_7 [1, 2] : vector<1x32x1xf32> to vector<1xf32>
    %24 = vector.shape_cast %23 : vector<1xf32> to vector<1x1x1xf32>
    %25 = vector.extract %24[0, 0, 0] : f32 from vector<1x1x1xf32>
    %26 = arith.subf %21, %25 : f32
    %cst_8 = arith.constant 3.200000e+01 : f32
    %27 = arith.divf %26, %cst_8 : f32
    %cst_9 = arith.constant 0.333333343 : f32
    %28 = vector.broadcast %cst_9 : f32 to vector<32x1xf32>
    %29 = arith.mulf %10, %28 : vector<32x1xf32>
    %cst_10 = arith.constant 0.333333343 : f32
    %30 = vector.broadcast %cst_10 : f32 to vector<32x16xf32>
    %31 = arith.mulf %12, %30 : vector<32x16xf32>
    %32 = math.exp %31 : vector<32x16xf32>
    %cst_11 = arith.constant dense<0.000000e+00> : vector<32xf32>
    %33 = vector.multi_reduction <add>, %32, %cst_11 [1] : vector<32x16xf32> to vector<32xf32>
    %34 = vector.shape_cast %33 : vector<32xf32> to vector<32x1xf32>
    %35 = math.log %34 : vector<32x1xf32>
    %36 = arith.addf %29, %35 : vector<32x1xf32>
    %37 = vector.extract_strided_slice %0 {offsets = [0, 0], sizes = [8, 16], strides = [1, 1]} : vector<32x16xf32> to vector<8x16xf32>
    %38 = vector.extract_strided_slice %36 {offsets = [0, 0], sizes = [8, 1], strides = [1, 1]} : vector<32x1xf32> to vector<8x1xf32>
    %39 = vector.extract_strided_slice %0 {offsets = [8, 0], sizes = [8, 16], strides = [1, 1]} : vector<32x16xf32> to vector<8x16xf32>
    %40 = arith.addf %37, %39 : vector<8x16xf32>
    %41 = vector.extract_strided_slice %36 {offsets = [8, 0], sizes = [8, 1], strides = [1, 1]} : vector<32x1xf32> to vector<8x1xf32>
    %42 = arith.addf %38, %41 : vector<8x1xf32>
    %43 = vector.extract_strided_slice %0 {offsets = [16, 0], sizes = [8, 16], strides = [1, 1]} : vector<32x16xf32> to vector<8x16xf32>
    %44 = arith.addf %40, %43 : vector<8x16xf32>
    %45 = vector.extract_strided_slice %36 {offsets = [16, 0], sizes = [8, 1], strides = [1, 1]} : vector<32x1xf32> to vector<8x1xf32>
    %46 = arith.addf %42, %45 : vector<8x1xf32>
    %47 = vector.extract_strided_slice %0 {offsets = [24, 0], sizes = [8, 16], strides = [1, 1]} : vector<32x16xf32> to vector<8x16xf32>
    %48 = arith.addf %44, %47 : vector<8x16xf32>
    %49 = vector.extract_strided_slice %36 {offsets = [24, 0], sizes = [8, 1], strides = [1, 1]} : vector<32x1xf32> to vector<8x1xf32>
    %50 = arith.addf %46, %49 : vector<8x1xf32>
    %cst_12 = arith.constant 0.333333343 : f32
    %cst_13 = arith.constant 4.000000e+00 : f32
    %51 = arith.divf %cst_12, %cst_13 : f32
    %52 = vector.broadcast %51 : f32 to vector<8x16xf32>
    %53 = arith.mulf %48, %52 : vector<8x16xf32>
    %cst_14 = arith.constant dense<0xFF800000> : vector<8xf32>
    %54 = vector.multi_reduction <maximumf>, %53, %cst_14 [1] : vector<8x16xf32> to vector<8xf32>
    %55 = vector.shape_cast %54 : vector<8xf32> to vector<8x1xf32>
    %56 = vector.broadcast %55 : vector<8x1xf32> to vector<8x16xf32>
    %57 = arith.subf %53, %56 : vector<8x16xf32>
    %58 = math.exp %57 : vector<8x16xf32>
    %cst_15 = arith.constant dense<0.000000e+00> : vector<8xf32>
    %59 = vector.multi_reduction <add>, %58, %cst_15 [1] : vector<8x16xf32> to vector<8xf32>
    %60 = vector.shape_cast %59 : vector<8xf32> to vector<8x1xf32>
    %61 = math.log %60 : vector<8x1xf32>
    %62 = arith.addf %55, %61 : vector<8x1xf32>
    %63 = vector.shape_cast %50 : vector<8x1xf32> to vector<1x8x1xf32>
    %cst_16 = arith.constant dense<0.000000e+00> : vector<1xf32>
    %64 = vector.multi_reduction <add>, %63, %cst_16 [1, 2] : vector<1x8x1xf32> to vector<1xf32>
    %65 = vector.shape_cast %64 : vector<1xf32> to vector<1x1x1xf32>
    %66 = vector.extract %65[0, 0, 0] : f32 from vector<1x1x1xf32>
    %67 = vector.shape_cast %62 : vector<8x1xf32> to vector<1x8x1xf32>
    %cst_17 = arith.constant dense<0.000000e+00> : vector<1xf32>
    %68 = vector.multi_reduction <add>, %67, %cst_17 [1, 2] : vector<1x8x1xf32> to vector<1xf32>
    %69 = vector.shape_cast %68 : vector<1xf32> to vector<1x1x1xf32>
    %70 = vector.extract %69[0, 0, 0] : f32 from vector<1x1x1xf32>
    %cst_18 = arith.constant 4.000000e+00 : f32
    %71 = arith.mulf %cst_18, %70 : f32
    %72 = arith.subf %66, %71 : f32
    %cst_19 = arith.constant 3.200000e+01 : f32
    %73 = arith.divf %72, %cst_19 : f32
    %c0_20 = arith.constant 0 : index
    %c0_21 = arith.constant 0 : index
    %c0_22 = arith.constant 0 : index
    %74 = vector.load %arg2[%c0_20, %c0_21, %c0_22] : memref<4x16x32xf32, #tpu.memory_space<vmem>>, vector<4x16x32xf32>
    %75 = arith.mulf %74, %74 : vector<4x16x32xf32>
    %cst_23 = arith.constant dense<0.000000e+00> : vector<4x16xf32>
    %76 = vector.multi_reduction <add>, %75, %cst_23 [2] : vector<4x16x32xf32> to vector<4x16xf32>
    %77 = vector.shape_cast %76 : vector<4x16xf32> to vector<4x16x1xf32>
    %cst_24 = arith.constant 1.000000e-24 : f32
    %78 = vector.broadcast %cst_24 : f32 to vector<4x16x1xf32>
    %79 = arith.maximumf %77, %78 : vector<4x16x1xf32>
    %80 = math.rsqrt %79 : vector<4x16x1xf32>
    %81 = vector.broadcast %80 : vector<4x16x1xf32> to vector<4x16x32xf32>
    %82 = arith.mulf %74, %81 : vector<4x16x32xf32>
    %83 = vector.extract_strided_slice %82 {offsets = [0, 0, 0], sizes = [1, 16, 32], strides = [1, 1, 1]} : vector<4x16x32xf32> to vector<1x16x32xf32>
    %84 = vector.shape_cast %83 : vector<1x16x32xf32> to vector<16x32xf32>
    %85 = vector.extract_strided_slice %82 {offsets = [1, 0, 0], sizes = [1, 16, 32], strides = [1, 1, 1]} : vector<4x16x32xf32> to vector<1x16x32xf32>
    %86 = vector.shape_cast %85 : vector<1x16x32xf32> to vector<16x32xf32>
    %87 = arith.mulf %84, %86 : vector<16x32xf32>
    %cst_25 = arith.constant dense<0.000000e+00> : vector<16xf32>
    %88 = vector.multi_reduction <add>, %87, %cst_25 [1] : vector<16x32xf32> to vector<16xf32>
    %89 = vector.shape_cast %88 : vector<16xf32> to vector<16x1xf32>
    %90 = math.absf %89 : vector<16x1xf32>
    %91 = vector.shape_cast %90 : vector<16x1xf32> to vector<1x16x1xf32>
    %cst_26 = arith.constant dense<0.000000e+00> : vector<1xf32>
    %92 = vector.multi_reduction <add>, %91, %cst_26 [1, 2] : vector<1x16x1xf32> to vector<1xf32>
    %93 = vector.shape_cast %92 : vector<1xf32> to vector<1x1x1xf32>
    %94 = vector.extract %93[0, 0, 0] : f32 from vector<1x1x1xf32>
    %cst_27 = arith.constant 0.000000e+00 : f32
    %95 = arith.addf %cst_27, %94 : f32
    %96 = vector.extract_strided_slice %82 {offsets = [0, 0, 0], sizes = [1, 16, 32], strides = [1, 1, 1]} : vector<4x16x32xf32> to vector<1x16x32xf32>
    %97 = vector.shape_cast %96 : vector<1x16x32xf32> to vector<16x32xf32>
    %98 = vector.extract_strided_slice %82 {offsets = [2, 0, 0], sizes = [1, 16, 32], strides = [1, 1, 1]} : vector<4x16x32xf32> to vector<1x16x32xf32>
    %99 = vector.shape_cast %98 : vector<1x16x32xf32> to vector<16x32xf32>
    %100 = arith.mulf %97, %99 : vector<16x32xf32>
    %cst_28 = arith.constant dense<0.000000e+00> : vector<16xf32>
    %101 = vector.multi_reduction <add>, %100, %cst_28 [1] : vector<16x32xf32> to vector<16xf32>
    %102 = vector.shape_cast %101 : vector<16xf32> to vector<16x1xf32>
    %103 = math.absf %102 : vector<16x1xf32>
    %104 = vector.shape_cast %103 : vector<16x1xf32> to vector<1x16x1xf32>
    %cst_29 = arith.constant dense<0.000000e+00> : vector<1xf32>
    %105 = vector.multi_reduction <add>, %104, %cst_29 [1, 2] : vector<1x16x1xf32> to vector<1xf32>
    %106 = vector.shape_cast %105 : vector<1xf32> to vector<1x1x1xf32>
    %107 = vector.extract %106[0, 0, 0] : f32 from vector<1x1x1xf32>
    %108 = arith.addf %95, %107 : f32
    %109 = vector.extract_strided_slice %82 {offsets = [0, 0, 0], sizes = [1, 16, 32], strides = [1, 1, 1]} : vector<4x16x32xf32> to vector<1x16x32xf32>
    %110 = vector.shape_cast %109 : vector<1x16x32xf32> to vector<16x32xf32>
    %111 = vector.extract_strided_slice %82 {offsets = [3, 0, 0], sizes = [1, 16, 32], strides = [1, 1, 1]} : vector<4x16x32xf32> to vector<1x16x32xf32>
    %112 = vector.shape_cast %111 : vector<1x16x32xf32> to vector<16x32xf32>
    %113 = arith.mulf %110, %112 : vector<16x32xf32>
    %cst_30 = arith.constant dense<0.000000e+00> : vector<16xf32>
    %114 = vector.multi_reduction <add>, %113, %cst_30 [1] : vector<16x32xf32> to vector<16xf32>
    %115 = vector.shape_cast %114 : vector<16xf32> to vector<16x1xf32>
    %116 = math.absf %115 : vector<16x1xf32>
    %117 = vector.shape_cast %116 : vector<16x1xf32> to vector<1x16x1xf32>
    %cst_31 = arith.constant dense<0.000000e+00> : vector<1xf32>
    %118 = vector.multi_reduction <add>, %117, %cst_31 [1, 2] : vector<1x16x1xf32> to vector<1xf32>
    %119 = vector.shape_cast %118 : vector<1xf32> to vector<1x1x1xf32>
    %120 = vector.extract %119[0, 0, 0] : f32 from vector<1x1x1xf32>
    %121 = arith.addf %108, %120 : f32
    %122 = vector.extract_strided_slice %82 {offsets = [1, 0, 0], sizes = [1, 16, 32], strides = [1, 1, 1]} : vector<4x16x32xf32> to vector<1x16x32xf32>
    %123 = vector.shape_cast %122 : vector<1x16x32xf32> to vector<16x32xf32>
    %124 = vector.extract_strided_slice %82 {offsets = [2, 0, 0], sizes = [1, 16, 32], strides = [1, 1, 1]} : vector<4x16x32xf32> to vector<1x16x32xf32>
    %125 = vector.shape_cast %124 : vector<1x16x32xf32> to vector<16x32xf32>
    %126 = arith.mulf %123, %125 : vector<16x32xf32>
    %cst_32 = arith.constant dense<0.000000e+00> : vector<16xf32>
    %127 = vector.multi_reduction <add>, %126, %cst_32 [1] : vector<16x32xf32> to vector<16xf32>
    %128 = vector.shape_cast %127 : vector<16xf32> to vector<16x1xf32>
    %129 = math.absf %128 : vector<16x1xf32>
    %130 = vector.shape_cast %129 : vector<16x1xf32> to vector<1x16x1xf32>
    %cst_33 = arith.constant dense<0.000000e+00> : vector<1xf32>
    %131 = vector.multi_reduction <add>, %130, %cst_33 [1, 2] : vector<1x16x1xf32> to vector<1xf32>
    %132 = vector.shape_cast %131 : vector<1xf32> to vector<1x1x1xf32>
    %133 = vector.extract %132[0, 0, 0] : f32 from vector<1x1x1xf32>
    %134 = arith.addf %121, %133 : f32
    %135 = vector.extract_strided_slice %82 {offsets = [1, 0, 0], sizes = [1, 16, 32], strides = [1, 1, 1]} : vector<4x16x32xf32> to vector<1x16x32xf32>
    %136 = vector.shape_cast %135 : vector<1x16x32xf32> to vector<16x32xf32>
    %137 = vector.extract_strided_slice %82 {offsets = [3, 0, 0], sizes = [1, 16, 32], strides = [1, 1, 1]} : vector<4x16x32xf32> to vector<1x16x32xf32>
    %138 = vector.shape_cast %137 : vector<1x16x32xf32> to vector<16x32xf32>
    %139 = arith.mulf %136, %138 : vector<16x32xf32>
    %cst_34 = arith.constant dense<0.000000e+00> : vector<16xf32>
    %140 = vector.multi_reduction <add>, %139, %cst_34 [1] : vector<16x32xf32> to vector<16xf32>
    %141 = vector.shape_cast %140 : vector<16xf32> to vector<16x1xf32>
    %142 = math.absf %141 : vector<16x1xf32>
    %143 = vector.shape_cast %142 : vector<16x1xf32> to vector<1x16x1xf32>
    %cst_35 = arith.constant dense<0.000000e+00> : vector<1xf32>
    %144 = vector.multi_reduction <add>, %143, %cst_35 [1, 2] : vector<1x16x1xf32> to vector<1xf32>
    %145 = vector.shape_cast %144 : vector<1xf32> to vector<1x1x1xf32>
    %146 = vector.extract %145[0, 0, 0] : f32 from vector<1x1x1xf32>
    %147 = arith.addf %134, %146 : f32
    %148 = vector.extract_strided_slice %82 {offsets = [2, 0, 0], sizes = [1, 16, 32], strides = [1, 1, 1]} : vector<4x16x32xf32> to vector<1x16x32xf32>
    %149 = vector.shape_cast %148 : vector<1x16x32xf32> to vector<16x32xf32>
    %150 = vector.extract_strided_slice %82 {offsets = [3, 0, 0], sizes = [1, 16, 32], strides = [1, 1, 1]} : vector<4x16x32xf32> to vector<1x16x32xf32>
    %151 = vector.shape_cast %150 : vector<1x16x32xf32> to vector<16x32xf32>
    %152 = arith.mulf %149, %151 : vector<16x32xf32>
    %cst_36 = arith.constant dense<0.000000e+00> : vector<16xf32>
    %153 = vector.multi_reduction <add>, %152, %cst_36 [1] : vector<16x32xf32> to vector<16xf32>
    %154 = vector.shape_cast %153 : vector<16xf32> to vector<16x1xf32>
    %155 = math.absf %154 : vector<16x1xf32>
    %156 = vector.shape_cast %155 : vector<16x1xf32> to vector<1x16x1xf32>
    %cst_37 = arith.constant dense<0.000000e+00> : vector<1xf32>
    %157 = vector.multi_reduction <add>, %156, %cst_37 [1, 2] : vector<1x16x1xf32> to vector<1xf32>
    %158 = vector.shape_cast %157 : vector<1xf32> to vector<1x1x1xf32>
    %159 = vector.extract %158[0, 0, 0] : f32 from vector<1x1x1xf32>
    %160 = arith.addf %147, %159 : f32
    %cst_38 = arith.constant 9.600000e+01 : f32
    %161 = arith.divf %160, %cst_38 : f32
    %c0_39 = arith.constant 0 : index
    %162 = memref.load %arg3[%c0_39] : memref<3xf32, #tpu.memory_space<smem>>
    memref.store %27, %arg3[%c0_39] : memref<3xf32, #tpu.memory_space<smem>>
    %c1 = arith.constant 1 : index
    %163 = memref.load %arg3[%c1] : memref<3xf32, #tpu.memory_space<smem>>
    memref.store %73, %arg3[%c1] : memref<3xf32, #tpu.memory_space<smem>>
    %c2 = arith.constant 2 : index
    %164 = memref.load %arg3[%c2] : memref<3xf32, #tpu.memory_space<smem>>
    memref.store %161, %arg3[%c2] : memref<3xf32, #tpu.memory_space<smem>>
    return
  }
}

</mosaic_0001>

<bundles_post_ra>
// kernel: tpu_custom_call.1
= control target key start
LH: loop header
LB: loop body
LE: loop exit
PB: predicated region body
PF: predicated region fallthrough
CT: control target
= control target key end

     0   :  { %vm45_vm0 = vcmask 130048   ;;  %v538_v7 = vmov 0   ;;  %vm243_vm1 = vcmask 261120   ;;  %s787_s0 = inlined_call_operand.vmem [shape: f32[32,16], index: 0, kind: input, shape index: {}]   ;;  %s788_s1 = inlined_call_operand.vmem [shape: s32[32,1], index: 1, kind: input, shape index: {}]   ;;  %s789_s2 = inlined_call_operand.vmem [shape: f32[4,16,32], index: 2, kind: input, shape index: {}]   ;;  %s790_s3 = inlined_call_operand.hbm [shape: f32[3], index: 3, kind: output, shape index: {}]  }
   0x1   :  { %v563_v0 = vld [vmem:[%s787_s0 + $0x10] sm:$0xff]  ;;  %v568_v1 = vld [vmem:[%s787_s0] sm:$0xff]  ;;  %v573_v2 = vld [vmem:[%s787_s0 + $0x18] sm:$0xff]  ;;  %474 = vset.pattern.permute.xlu1 %v538_v7  ;;  %475 = vset.pattern.permute.xlu0 %v538_v7 }
   0x2   :  { %v64_v3 = vsel %vm45_vm0, %v563_v0, -inf  ;;  %v58_v4 = vsel %vm45_vm0, %v568_v1, -inf  ;;  %v582_v5 = vld [vmem:[%s787_s0 + $0x8] sm:$0xff]  ;;  %v587_v6 = vld [vmem:[%s789_s2] sm:$0xff]  ;;  %v67_v9 = vsel %vm45_vm0, %v573_v2, -inf  ;;  %v601_v13 = vld [vmem:[%s789_s2 + $0x10] sm:$0xff] }
   0x3   :  { %65 = vmax.xlane.f32.xlu1 %v64_v3  ;;  %59 = vmax.xlane.f32.xlu0 %v58_v4  ;;  %v183_v8 = vadd.f32 %v582_v5, %v568_v1  ;;  %v61_v10 = vsel %vm45_vm0, %v582_v5, -inf  ;;  %v235_v11 = vmul.f32 %v587_v6, %v587_v6  ;;  %v606_v14 = vld [vmem:[%s789_s2 + $0x8] sm:$0xff] }
   0x5   :  { %v185_v12 = vadd.f32 %v183_v8, %v563_v0 }
   0x6   :  { %8 = vsyncpa [#allocation3], 0  ;;  %v244_v16 = vsel %vm243_vm1, %v235_v11, 0.0  ;;  %v237_v17 = vmul.f32 %v601_v13, %v601_v13  ;;  %v236_v19 = vmul.f32 %v606_v14, %v606_v14  ;;  %v619_v20 = vld [vmem:[%s789_s2 + $0x20] sm:$0xff]  ;;  %v624_v21 = vld [vmem:[%s789_s2 + $0x18] sm:$0xff]  ;;  %v23_v59 = vlaneseq  ;;  %s539_s7 = smov [#allocation2]  }
   0x7   :  { %68 = vmax.xlane.f32.xlu1 %v67_v9  ;;  %62 = vmax.xlane.f32.xlu0 %v61_v10  ;;  %v187_v15 = vadd.f32 %v185_v12, %v573_v2  ;;  %v239_v24 = vmul.f32 %v619_v20, %v619_v20  ;;  %v238_v26 = vmul.f32 %v624_v21, %v624_v21  ;;  %v637_v27 = vld [vmem:[%s789_s2 + $0x30] sm:$0xff]  ;;  %v642_v28 = vld [vmem:[%s789_s2 + $0x28] sm:$0xff]  ;;  %v653_v33 = vld [vmem:[%s789_s2 + $0x38] sm:$0xff]  ;;  %vm106_vm6 = vcmask 7168  }
   0x8   :  { %v250_v23 = vsel %vm243_vm1, %v237_v17, 0.0  ;;  %v247_v25 = vsel %vm243_vm1, %v236_v19, 0.0  ;;  %v241_v30 = vmul.f32 %v637_v27, %v637_v27  ;;  %v240_v32 = vmul.f32 %v642_v28, %v642_v28  ;;  %v19_v38 = vld [vmem:[%s788_s1] sm:$0xff]  ;;  %v21_v39 = vld [vmem:[%s788_s1 + $0x10] sm:$0xff]  ;;  %v22_v40 = vld [vmem:[%s788_s1 + $0x18] sm:$0xff] }
   0x9   :  { %v612_v18 = vmul.f32 0.083333336, %v187_v15  ;;  %v256_v29 = vsel %vm243_vm1, %v239_v24, 0.0  ;;  %v253_v31 = vsel %vm243_vm1, %v238_v26, 0.0  ;;  %v242_v36 = vmul.f32 %v653_v33, %v653_v33  ;;  %v20_v41 = vld [vmem:[%s788_s1 + $0x8] sm:$0xff] }
   0xa   :  { %v262_v34 = vsel %vm243_vm1, %v241_v30, 0.0  ;;  %v259_v35 = vsel %vm243_vm1, %v240_v32, 0.0  ;;  %v690_v8 = vand.u32 127, %v23_v59 }
   0xb   :  { %245 = vadd.xlane.f32.xlu1 %v244_v16  ;;  %v190_v22 = vsel %vm45_vm0, %v612_v18, -inf  ;;  %v265_v37 = vsel %vm243_vm1, %v242_v36, 0.0 }
   0xc   :  { %191 = vmax.xlane.f32.xlu0 %v190_v22 }
   0xf   :  { %251 = vadd.xlane.f32.xlu1 %v250_v23 }
  0x10   :  { %248 = vadd.xlane.f32.xlu0 %v247_v25 }
  0x13   :  { %257 = vadd.xlane.f32.xlu1 %v256_v29 }
  0x14   :  { %254 = vadd.xlane.f32.xlu0 %v253_v31 }
  0x17   :  { %263 = vadd.xlane.f32.xlu1 %v262_v34 }
  0x18   :  { %260 = vadd.xlane.f32.xlu0 %v259_v35 }
  0x1c   :  { %266 = vadd.xlane.f32.xlu0 %v265_v37 }
  0x28   :  { %26 = vperm.xlu1 %474, %v19_v38  }
  0x2c   :  { %32 = vperm.xlu1 %474, %v21_v39  }
  0x30   :  { %35 = vperm.xlu1 %474, %v22_v40  }
  0x32   :  { %29 = vperm.xlu0 %475, %v20_v41  }
  0x8c   :  { %v672_v42 = vpop.xlane.xlu1 %65  ;;  %v674_v43 = vpop.xlane.xlu0 %59 }
  0x8d   :  { %v70_v53 = vsub.f32 %v568_v1, %v674_v43  ;;  %v72_v63 = vsub.f32 %v563_v0, %v672_v42 }
  0x8f   :  { %v74_v60 = vmul.f32 1.442695, %v70_v53  ;;  %v78_v10 = vmul.f32 1.442695, %v72_v63  ;;  %v147_v19 = vmul.f32 0.33333334, %v70_v53 }
  0x90   :  { %v676_v44 = vpop.xlane.xlu1 %68  ;;  %v678_v45 = vpop.xlane.xlu0 %62  ;;  %v149_v40 = vmul.f32 0.33333334, %v72_v63 }
  0x91   :  { %v73_v46 = vsub.f32 %v573_v2, %v676_v44  ;;  %v71_v49 = vsub.f32 %v582_v5, %v678_v45  ;;  %v151_v30 = vmul.f32 1.442695, %v147_v19 }
  0x93   :  { %v150_v50 = vmul.f32 0.33333334, %v73_v46  ;;  %v76_v54 = vmul.f32 1.442695, %v71_v49  ;;  %v80_v22 = vmul.f32 1.442695, %v73_v46 }
  0x94   :  { %v246_v47 = vpop.xlane.xlu1 %245  ;;  %v148_v31 = vmul.f32 0.33333334, %v71_v49 }
  0x95   :  { %v682_v48 = vpop.xlane.xlu0 %191  ;;  %v157_v55 = vmul.f32 1.442695, %v150_v50  ;;  %476 = vpow2.f32 %v76_v54  ;;  %v268_v62 = vmax.f32 %v246_v47, 1e-24 }
  0x96   :  { %v153_v41 = vmul.f32 1.442695, %v148_v31 }
  0x97   :  { %478 = vpow2.f32 %v157_v55 }
  0x98   :  { %v252_v51 = vpop.xlane.xlu1 %251 }
  0x99   :  { %v249_v52 = vpop.xlane.xlu0 %248  ;;  %v270_v12 = vmax.f32 %v252_v51, 1e-24 }
  0x9a   :  { %v269_v57 = vmax.f32 %v249_v52, 1e-24  ;;  %v155_v52 = vmul.f32 1.442695, %v149_v40 }
  0x9c   :  { %v258_v56 = vpop.xlane.xlu1 %257 }
  0x9d   :  { %v255_v58 = vpop.xlane.xlu0 %254  ;;  %v272_v16 = vmax.f32 %v258_v56, 1e-24 }
  0x9e   :  { %v271_v61 = vmax.f32 %v255_v58, 1e-24 }
  0xa0   :  { %480 = vrsqrt.f32 %v271_v61  ;;  %v264_v3 = vpop.xlane.xlu1 %263 }
  0xa1   :  { %482 = vrsqrt.f32 %v269_v57  ;;  %v274_v4 = vmax.f32 %v264_v3, 1e-24  ;;  %v261_v7 = vpop.xlane.xlu0 %260 }
  0xa2   :  { %484 = vpow2.f32 %v74_v60  ;;  %v273_v9 = vmax.f32 %v261_v7, 1e-24  ;;  %v477_v26 = vpop.eup %476 }
  0xa3   :  { %486 = vrsqrt.f32 %v268_v62  ;;  %v85_v38 = vsel %vm45_vm0, %v477_v26, 0.0 }
  0xa4   :  { %488 = vrsqrt.f32 %v273_v9  ;;  %v27_v11 = vpop.permute.xlu1 %26 }
  0xa5   :  { %490 = vrsqrt.f32 %v274_v4  ;;  %vm37_vm2 = vcmp.eq.s32.totalorder %v690_v8, %v27_v11  ;;  %v695_v24 = vpop.xlane.xlu0 %266 }
  0xa6   :  { %v41_v15 = vsel %vm37_vm2, %v568_v1, 0.0  ;;  %492 = vpow2.f32 %v78_v10  ;;  %v479_v1 = vpop.eup %478  ;;  %v275_v10 = vmax.f32 %v695_v24, 1e-24 }
  0xa7   :  { %v46_v17 = vsel %vm45_vm0, %v41_v15, 0.0  ;;  %494 = vrsqrt.f32 %v270_v12  ;;  %v168_v49 = vsel %vm45_vm0, %v479_v1, 0.0 }
  0xa8   :  { %v33_v23 = vpop.permute.xlu1 %32  ;;  %47 = vadd.xlane.f32.xlu0 %v46_v17  ;;  %496 = vrsqrt.f32 %v272_v16 }
  0xa9   :  { %vm39_vm3 = vcmp.eq.s32.totalorder %v690_v8, %v33_v23  ;;  %498 = vpow2.f32 %v80_v22 }
  0xaa   :  { %v43_v25 = vsel %vm39_vm3, %v563_v0, 0.0  ;;  %500 = vpow2.f32 %v151_v30 }
  0xab   :  { %v52_v29 = vsel %vm45_vm0, %v43_v25, 0.0  ;;  %502 = vpow2.f32 %v153_v41 }
  0xac   :  { %53 = vadd.xlane.f32.xlu0 %v52_v29  ;;  %504 = vpow2.f32 %v155_v52  ;;  %v36_v29 = vpop.permute.xlu1 %35 }
  0xad   :  { %v481_v32 = vpop.eup %480  ;;  %v30_v34 = vpop.permute.xlu0 %29  ;;  %vm40_vm5 = vcmp.eq.s32.totalorder %v690_v8, %v36_v29  ;;  %v144_v29 = vmul.f32 0.33333334, %v678_v45 }
  0xae   :  { %v483_v35 = vpop.eup %482  ;;  %vm38_vm4 = vcmp.eq.s32.totalorder %v690_v8, %v30_v34  ;;  %v704_v0 = vmul.f32 %v481_v32, %v624_v21 }
  0xaf   :  { %v485_v36 = vpop.eup %484  ;;  %v42_v37 = vsel %vm38_vm4, %v582_v5, 0.0  ;;  %v709_v50 = vmul.f32 %v483_v35, %v606_v14  ;;  %v44_v35 = vsel %vm40_vm5, %v573_v2, 0.0 }
  0xb0   :  { %v487_v39 = vpop.eup %486  ;;  %v49_v46 = vsel %vm45_vm0, %v42_v37, 0.0  ;;  %86 = vadd.xlane.f32.xlu0 %v85_v38  ;;  %v82_v53 = vsel %vm45_vm0, %v485_v36, 0.0  ;;  %v55_v36 = vsel %vm45_vm0, %v44_v35, 0.0 }
  0xb1   :  { %v489_v47 = vpop.eup %488  ;;  %50 = vadd.xlane.f32.xlu1 %v49_v46  ;;  %v293_v51 = vmul.f32 %v704_v0, %v709_v50  ;;  %v284_v55 = vmul.f32 %v487_v39, %v587_v6 }
  0xb2   :  { %v491_v5 = vpop.eup %490  ;;  %v714_v21 = vmul.f32 %v489_v47, %v642_v28  ;;  %v193_v28 = vsub.f32 %v612_v18, %v682_v48 }
  0xb3   :  { %v493_v54 = vpop.eup %492  ;;  %v290_v56 = vmul.f32 %v491_v5, %v637_v27  ;;  %v297_v57 = vsel %vm243_vm1, %v293_v51, 0.0 }
  0xb4   :  { %169 = vadd.xlane.f32.xlu0 %v168_v49  ;;  %v495_v14 = vpop.eup %494  ;;  %v316_v58 = vmul.f32 %v714_v21, %v709_v50  ;;  %v88_v60 = vsel %vm45_vm0, %v493_v54, 0.0  ;;  %v194_v3 = vmul.f32 1.442695, %v193_v28  ;;  %v362_v39 = vmul.f32 %v714_v21, %v704_v0 }
  0xb5   :  { %83 = vadd.xlane.f32.xlu1 %v82_v53  ;;  %v497_v59 = vpop.eup %496  ;;  %v338_v62 = vmul.f32 %v290_v56, %v284_v55  ;;  %v286_v27 = vmul.f32 %v495_v14, %v601_v13 }
  0xb6   :  { %v499_v61 = vpop.eup %498  ;;  %v320_v6 = vsel %vm243_vm1, %v316_v58, 0.0  ;;  %v288_v63 = vmul.f32 %v497_v59, %v619_v20  ;;  %506 = vpow2.f32 %v194_v3  ;;  %v366_v8 = vsel %vm243_vm1, %v362_v39, 0.0 }
  0xb7   :  { %v91_v4 = vsel %vm45_vm0, %v499_v61, 0.0  ;;  %v501_v7 = vpop.eup %500  ;;  %v340_v18 = vsel %vm243_vm1, %v338_v62, 0.0  ;;  %v384_v20 = vmul.f32 %v290_v56, %v286_v27  ;;  %508 = vrsqrt.f32 %v275_v10 }
  0xb8   :  { %298 = vadd.xlane.f32.xlu0 %v297_v57  ;;  %v361_v9 = vmul.f32 %v288_v63, %v286_v27  ;;  %v159_v11 = vsel %vm45_vm0, %v501_v7, 0.0  ;;  %v503_v12 = vpop.eup %502  ;;  %v407_v19 = vmul.f32 %v290_v56, %v288_v63  ;;  %v292_v23 = vmul.f32 %v286_v27, %v284_v55 }
  0xb9   :  { %89 = vadd.xlane.f32.xlu1 %v88_v60  ;;  %v162_v15 = vsel %vm45_vm0, %v503_v12, 0.0  ;;  %v505_v16 = vpop.eup %504  ;;  %v386_v17 = vsel %vm243_vm1, %v384_v20, 0.0  ;;  %v315_v30 = vmul.f32 %v288_v63, %v284_v55 }
  0xba   :  { %v363_v13 = vsel %vm243_vm1, %v361_v9, 0.0  ;;  %v165_v22 = vsel %vm45_vm0, %v505_v16, 0.0  ;;  %v409_v24 = vsel %vm243_vm1, %v407_v19, 0.0  ;;  %v294_v25 = vsel %vm243_vm1, %v292_v23, 0.0 }
  0xbb   :  { %v317_v32 = vsel %vm243_vm1, %v315_v30, 0.0 }
  0xbc   :  { %321 = vadd.xlane.f32.xlu0 %v320_v6 }
  0xbd   :  { %92 = vadd.xlane.f32.xlu1 %v91_v4 }
  0xc0   :  { %341 = vadd.xlane.f32.xlu0 %v340_v18 }
  0xc1   :  { %160 = vadd.xlane.f32.xlu1 %v159_v11 }
  0xc3   :  { %v507_v26 = vpop.eup %506 }
  0xc4   :  { %364 = vadd.xlane.f32.xlu0 %v363_v13  ;;  %v196_v1 = vsel %vm45_vm0, %v507_v26, 0.0  ;;  %v509_v31 = vpop.eup %508 }
  0xc5   :  { %163 = vadd.xlane.f32.xlu1 %v162_v15  ;;  %v291_v34 = vmul.f32 %v509_v31, %v653_v33 }
  0xc7   :  { %v339_v37 = vmul.f32 %v291_v34, %v709_v50  ;;  %v385_v40 = vmul.f32 %v291_v34, %v704_v0  ;;  %v408_v2 = vmul.f32 %v291_v34, %v714_v21 }
  0xc8   :  { %387 = vadd.xlane.f32.xlu0 %v386_v17 }
  0xc9   :  { %166 = vadd.xlane.f32.xlu1 %v165_v22  ;;  %v343_v38 = vsel %vm243_vm1, %v339_v37, 0.0  ;;  %v389_v33 = vsel %vm243_vm1, %v385_v40, 0.0  ;;  %v412_v41 = vsel %vm243_vm1, %v408_v2, 0.0 }
  0xcc   :  { %410 = vadd.xlane.f32.xlu0 %v409_v24 }
  0xcd   :  { %295 = vadd.xlane.f32.xlu1 %v294_v25 }
  0xd1   :  { %197 = vadd.xlane.f32.xlu1 %v196_v1 }
  0xd5   :  { %318 = vadd.xlane.f32.xlu1 %v317_v32 }
  0xd9   :  { %56 = vadd.xlane.f32.xlu1 %v55_v36  ;;  %v143_v36 = vmul.f32 0.33333334, %v674_v43 }
  0xdd   :  { %344 = vadd.xlane.f32.xlu1 %v343_v38 }
  0xe1   :  { %367 = vadd.xlane.f32.xlu1 %v366_v8  ;;  %v145_v8 = vmul.f32 0.33333334, %v672_v42 }
  0xe5   :  { %390 = vadd.xlane.f32.xlu1 %v389_v33 }
  0xe9   :  { %413 = vadd.xlane.f32.xlu1 %v412_v41 }
 0x131   :  { %v48_v46 = vpop.xlane.xlu0 %47 }
 0x132   :  { %v123_v19 = vsel %vm106_vm6, %v48_v46, 0.0 }
 0x135   :  { %v54_v47 = vpop.xlane.xlu0 %53 }
 0x136   :  { %v126_v37 = vsel %vm106_vm6, %v54_v47, 0.0 }
 0x139   :  { %v87_v50 = vpop.xlane.xlu0 %86 }
 0x13a   :  { %v51_v49 = vpop.xlane.xlu1 %50 }
 0x13b   :  { %v124_v22 = vsel %vm106_vm6, %v51_v49, 0.0 }
 0x13c   :  { %v125_v32 = vadd.f32 %v124_v22, %v123_v19 }
 0x13d   :  { %v170_v0 = vpop.xlane.xlu0 %169 }
 0x13e   :  { %v84_v5 = vpop.xlane.xlu1 %83 }
 0x13f   :  { %510 = vlog2.f32 %v84_v5 }
 0x140   :  { %512 = vlog2.f32 %v87_v50  ;;  %v127_v50 = vadd.f32 %v126_v37, %v125_v32 }
 0x141   :  { %v299_v57 = vpop.xlane.xlu0 %298 }
 0x142   :  { %v90_v51 = vpop.xlane.xlu1 %89  ;;  %v301_v27 = vand.u32 2147483647, %v299_v57 }
 0x143   :  { %514 = vlog2.f32 %v90_v51 }
 0x144   :  { %v303_v11 = vsel %vm106_vm6, %v301_v27, 0.0 }
 0x145   :  { %v322_v3 = vpop.xlane.xlu0 %321 }
 0x146   :  { %v93_v52 = vpop.xlane.xlu1 %92  ;;  %v324_v5 = vand.u32 2147483647, %v322_v3 }
 0x147   :  { %516 = vlog2.f32 %v93_v52 }
 0x149   :  { %v342_v25 = vpop.xlane.xlu0 %341 }
 0x14a   :  { %v161_v53 = vpop.xlane.xlu1 %160 }
 0x14b   :  { %518 = vlog2.f32 %v161_v53 }
 0x14c   :  { %v511_v54 = vpop.eup %510 }
 0x14d   :  { %v513_v21 = vpop.eup %512  ;;  %v95_v56 = vmul.f32 0.6931472, %v511_v54  ;;  %v365_v46 = vpop.xlane.xlu0 %364 }
 0x14e   :  { %v164_v55 = vpop.xlane.xlu1 %163  ;;  %v97_v58 = vmul.f32 0.6931472, %v513_v21  ;;  %v346_v21 = vand.u32 2147483647, %v342_v25 }
 0x14f   :  { %520 = vlog2.f32 %v164_v55  ;;  %v102_v60 = vadd.f32 %v95_v56, %v674_v43 }
 0x150   :  { %v515_v14 = vpop.eup %514  ;;  %522 = vlog2.f32 %v170_v0  ;;  %v103_v62 = vadd.f32 %v97_v58, %v678_v45  ;;  %v146_v45 = vmul.f32 0.33333334, %v676_v44 }
 0x151   :  { %v99_v59 = vmul.f32 0.6931472, %v515_v14  ;;  %v107_v9 = vsel %vm106_vm6, %v102_v60, 0.0  ;;  %v388_v57 = vpop.xlane.xlu0 %387 }
 0x152   :  { %v167_v28 = vpop.xlane.xlu1 %166  ;;  %v108_v12 = vsel %vm106_vm6, %v103_v62, 0.0  ;;  %v369_v62 = vand.u32 2147483647, %v365_v46 }
 0x153   :  { %524 = vlog2.f32 %v167_v28  ;;  %v104_v6 = vadd.f32 %v99_v59, %v672_v42  ;;  %v109_v17 = vadd.f32 %v108_v12, %v107_v9 }
 0x154   :  { %v517_v61 = vpop.eup %516  ;;  %v371_v12 = vsel %vm106_vm6, %v369_v62, 0.0 }
 0x155   :  { %v101_v63 = vmul.f32 0.6931472, %v517_v61  ;;  %v110_v13 = vsel %vm106_vm6, %v104_v6, 0.0  ;;  %v411_v9 = vpop.xlane.xlu0 %410 }
 0x156   :  { %v296_v4 = vpop.xlane.xlu1 %295  ;;  %v111_v26 = vadd.f32 %v110_v13, %v109_v17 }
 0x157   :  { %v300_v7 = vand.u32 2147483647, %v296_v4  ;;  %v105_v18 = vadd.f32 %v101_v63, %v676_v44  ;;  %v326_v44 = vsel %vm106_vm6, %v324_v5, 0.0  ;;  %v348_v63 = vsel %vm106_vm6, %v346_v21, 0.0 }
 0x158   :  { %v519_v20 = vpop.eup %518  ;;  %v392_v4 = vand.u32 2147483647, %v388_v57 }
 0x159   :  { %v302_v10 = vsel %vm106_vm6, %v300_v7, 0.0  ;;  %v112_v23 = vsel %vm106_vm6, %v105_v18, 0.0  ;;  %v172_v1 = vmul.f32 0.6931472, %v519_v20  ;;  %v415_v20 = vand.u32 2147483647, %v411_v9 }
 0x15a   :  { %v198_v15 = vpop.xlane.xlu1 %197  ;;  %v304_v16 = vadd.f32 %v303_v11, %v302_v10  ;;  %v113_v35 = vadd.f32 %v112_v23, %v111_v26 }
 0x15b   :  { %526 = vlog2.f32 %v198_v15  ;;  %v179_v33 = vadd.f32 %v172_v1, %v143_v36  ;;  %v394_v15 = vsel %vm106_vm6, %v392_v4, 0.0  ;;  %v417_v22 = vsel %vm106_vm6, %v415_v20, 0.0 }
 0x15c   :  { %v521_v24 = vpop.eup %520  ;;  %305 = vadd.xlane.f32.xlu0 %v304_v16 }
 0x15d   :  { %v174_v30 = vmul.f32 0.6931472, %v521_v24  ;;  %v523_v31 = vpop.eup %522 }
 0x15e   :  { %v319_v34 = vpop.xlane.xlu1 %318  ;;  %v178_v40 = vmul.f32 0.6931472, %v523_v31 }
 0x15f   :  { %v180_v38 = vadd.f32 %v174_v30, %v144_v29  ;;  %v323_v41 = vand.u32 2147483647, %v319_v34 }
 0x160   :  { %v525_v39 = vpop.eup %524  ;;  %114 = vadd.xlane.f32.xlu0 %v113_v35  ;;  %v182_v0 = vadd.f32 %v178_v40, %v146_v45 }
 0x161   :  { %v176_v2 = vmul.f32 0.6931472, %v525_v39  ;;  %v184_v52 = vadd.f32 %v180_v38, %v179_v33  ;;  %v325_v42 = vsel %vm106_vm6, %v323_v41, 0.0 }
 0x162   :  { %v57_v49 = vpop.xlane.xlu1 %56  ;;  %v327_v58 = vadd.f32 %v326_v44, %v325_v42 }
 0x163   :  { %v181_v51 = vadd.f32 %v176_v2, %v145_v8  ;;  %v128_v43 = vsel %vm106_vm6, %v57_v49, 0.0 }
 0x164   :  { %v129_v47 = vadd.f32 %v128_v43, %v127_v50 }
 0x165   :  { %v186_v53 = vadd.f32 %v184_v52, %v181_v51 }
 0x166   :  { %v345_v54 = vpop.xlane.xlu1 %344  ;;  %130 = vadd.xlane.f32.xlu1 %v129_v47 }
 0x167   :  { %v347_v55 = vand.u32 2147483647, %v345_v54  ;;  %v188_v56 = vadd.f32 %v186_v53, %v182_v0 }
 0x168   :  { %v527_v14 = vpop.eup %526 }
 0x169   :  { %v200_v59 = vmul.f32 0.6931472, %v527_v14  ;;  %v202_v28 = vsel %vm106_vm6, %v188_v56, 0.0  ;;  %v349_v60 = vsel %vm106_vm6, %v347_v55, 0.0 }
 0x16a   :  { %v368_v61 = vpop.xlane.xlu1 %367  ;;  %203 = vadd.xlane.f32.xlu0 %v202_v28  ;;  %328 = vadd.xlane.f32.xlu1 %v327_v58  ;;  %v350_v3 = vadd.f32 %v349_v60, %v348_v63 }
 0x16b   :  { %v370_v6 = vand.u32 2147483647, %v368_v61  ;;  %v201_v27 = vadd.f32 %v200_v59, %v682_v48 }
 0x16d   :  { %v212_v7 = vsel %vm106_vm6, %v201_v27, 0.0  ;;  %v372_v18 = vsel %vm106_vm6, %v370_v6, 0.0 }
 0x16e   :  { %v391_v10 = vpop.xlane.xlu1 %390  ;;  %213 = vadd.xlane.f32.xlu1 %v212_v7  ;;  %351 = vadd.xlane.f32.xlu0 %v350_v3  ;;  %v373_v13 = vadd.f32 %v372_v18, %v371_v12 }
 0x16f   :  { %v393_v11 = vand.u32 2147483647, %v391_v10 }
 0x171   :  { %v395_v48 = vsel %vm106_vm6, %v393_v11, 0.0 }
 0x172   :  { %v414_v16 = vpop.xlane.xlu1 %413  ;;  %374 = vadd.xlane.f32.xlu1 %v373_v13  ;;  %v396_v17 = vadd.f32 %v395_v48, %v394_v15 }
 0x173   :  { %v416_v19 = vand.u32 2147483647, %v414_v16 }
 0x174   :  { %397 = vadd.xlane.f32.xlu0 %v396_v17 }
 0x175   :  { %v418_v23 = vsel %vm106_vm6, %v416_v19, 0.0 }
 0x176   :  { %v419_v24 = vadd.f32 %v418_v23, %v417_v22 }
 0x178   :  { %420 = vadd.xlane.f32.xlu1 %v419_v24 }
 0x1e5   :  { %v306_v25 = vpop.xlane.xlu0 %305 }
 0x1e6   :  { %v307_v31 = vrot.slane %v306_v25, 4 }
 0x1e8   :  { %v308_v38 = vadd.f32 %v307_v31, %v306_v25 }
 0x1e9   :  { %v115_v26 = vpop.xlane.xlu0 %114 }
 0x1ea   :  { %v116_v29 = vrot.slane %v115_v26, 4  ;;  %v309_v50 = vrot.slane %v308_v38, 2 }
 0x1ec   :  { %v117_v1 = vadd.f32 %v116_v29, %v115_v26  ;;  %v310_v44 = vadd.f32 %v309_v50, %v308_v38 }
 0x1ee   :  { %v118_v30 = vrot.slane %v117_v1, 2  ;;  %v311_v63 = vrot.slane %v310_v44, 1 }
 0x1ef   :  { %v131_v32 = vpop.xlane.xlu1 %130 }
 0x1f0   :  { %v132_v34 = vrot.slane %v131_v32, 4  ;;  %v119_v35 = vadd.f32 %v118_v30, %v117_v1  ;;  %v312_v48 = vadd.f32 %v311_v63, %v310_v44 }
 0x1f2   :  { %v133_v36 = vadd.f32 %v132_v34, %v131_v32  ;;  %v120_v37 = vrot.slane %v119_v35, 1 }
 0x1f3   :  { %v329_v39 = vpop.xlane.xlu1 %328  ;;  %v204_v8 = vpop.xlane.xlu0 %203 }
 0x1f4   :  { %v134_v40 = vrot.slane %v133_v36, 2  ;;  %v330_v33 = vrot.slane %v329_v39, 4  ;;  %v205_v2 = vrot.slane %v204_v8, 4  ;;  %v121_v41 = vadd.f32 %v120_v37, %v119_v35 }
 0x1f6   :  { %v331_v45 = vadd.f32 %v330_v33, %v329_v39  ;;  %v206_v46 = vadd.f32 %v205_v2, %v204_v8  ;;  %452 = vpush %v121_v41  ;;  %v135_v49 = vadd.f32 %v134_v40, %v133_v36 }
 0x1f7   :  { %v214_v5 = vpop.xlane.xlu1 %213  ;;  %v352_v51 = vpop.xlane.xlu0 %351 }
 0x1f8   :  { %v332_v43 = vrot.slane %v331_v45, 2  ;;  %v207_v52 = vrot.slane %v206_v46, 2  ;;  %v215_v47 = vrot.slane %v214_v5, 4  ;;  %v353_v0 = vrot.slane %v352_v51, 4 }
 0x1f9   :  { %v136_v53 = vrot.slane %v135_v49, 1 }
 0x1fa   :  { %v216_v42 = vadd.f32 %v215_v47, %v214_v5  ;;  %v354_v54 = vadd.f32 %v353_v0, %v352_v51  ;;  %v208_v21 = vadd.f32 %v207_v52, %v206_v46  ;;  %v333_v14 = vadd.f32 %v332_v43, %v331_v45 }
 0x1fb   :  { %v375_v55 = vpop.xlane.xlu1 %374  ;;  %v137_v56 = vadd.f32 %v136_v53, %v135_v49 }
 0x1fc   :  { %v217_v57 = vrot.slane %v216_v42, 2  ;;  %v355_v58 = vrot.slane %v354_v54, 2  ;;  %v376_v59 = vrot.slane %v375_v55, 4  ;;  %v209_v28 = vrot.slane %v208_v21, 1 }
 0x1fd   :  { %454 = vpush %v137_v56  ;;  %v398_v60 = vpop.xlane.xlu0 %397  ;;  %v334_v9 = vrot.slane %v333_v14, 1 }
 0x1fe   :  { %v377_v61 = vadd.f32 %v376_v59, %v375_v55  ;;  %v399_v62 = vrot.slane %v398_v60, 4  ;;  %v210_v6 = vadd.f32 %v209_v28, %v208_v21  ;;  %v218_v27 = vadd.f32 %v217_v57, %v216_v42 }
 0x1ff   :  { %v356_v3 = vadd.f32 %v355_v58, %v354_v54  ;;  %v335_v22 = vadd.f32 %v334_v9, %v333_v14 }
 0x200   :  { %v378_v4 = vrot.slane %v377_v61, 2  ;;  %v400_v7 = vadd.f32 %v399_v62, %v398_v60  ;;  %456 = vpush %v210_v6  ;;  %v219_v18 = vrot.slane %v218_v27, 1 }
 0x201   :  { %v421_v10 = vpop.xlane.xlu1 %420  ;;  %v357_v11 = vrot.slane %v356_v3, 1 }
 0x202   :  { %v401_v12 = vrot.slane %v400_v7, 2  ;;  %v422_v13 = vrot.slane %v421_v10, 4  ;;  %v220_v20 = vadd.f32 %v219_v18, %v218_v27  ;;  %v379_v15 = vadd.f32 %v378_v4, %v377_v61 }
 0x203   :  { %v358_v16 = vadd.f32 %v357_v11, %v356_v3 }
 0x204   :  { %v402_v17 = vadd.f32 %v401_v12, %v400_v7  ;;  %v423_v19 = vadd.f32 %v422_v13, %v421_v10  ;;  %458 = vpush %v220_v20  ;;  %v380_v23 = vrot.slane %v379_v15, 1 }
 0x205   :  { %460 = vpush %v312_v48 }
 0x206   :  { %v424_v24 = vrot.slane %v423_v19, 2  ;;  %462 = vpush %v335_v22  ;;  %v381_v25 = vadd.f32 %v380_v23, %v379_v15  ;;  %v403_v26 = vrot.slane %v402_v17, 1 }
 0x207   :  { %464 = vpush %v358_v16 }
 0x208   :  { %v425_v29 = vadd.f32 %v424_v24, %v423_v19  ;;  %466 = vpush %v381_v25  ;;  %v404_v1 = vadd.f32 %v403_v26, %v402_v17 }
 0x20a   :  { %468 = vpush %v404_v1  ;;  %v426_v30 = vrot.slane %v425_v29, 1 }
 0x20c   :  { %v427_v31 = vadd.f32 %v426_v30, %v425_v29 }
 0x20e   :  { %470 = vpush %v427_v31 }
 0x227   :  { %s453_s1 = spop %452 }
 0x22e   :  { %s455_s15 = spop %454 }
 0x22f   :  { %s139_s16 = ssub.f32 %s453_s1, %s455_s15 }
 0x231   :  { %s142_s17 = smul.f32 0.03125, %s139_s16  ;;  %s457_s18 = spop %456 }
 0x233   :  { %434 = sst [smem:[#allocation2]] %s142_s17 }
 0x235   :  { %s459_s19 = spop %458 }
 0x236   :  { %s222_s20 = smul.f32 4.0, %s459_s19  ;;  %s461_s21 = spop %460 }
 0x237   :  { %s463_s0 = spop %462 }
 0x238   :  { %s223_s22 = ssub.f32 %s457_s18, %s222_s20  ;;  %s465_s24 = spop %464 }
 0x239   :  { %s337_s23 = sadd.f32 %s463_s0, %s461_s21  ;;  %s467_s26 = spop %466 }
 0x23a   :  { %s226_s25 = smul.f32 0.03125, %s223_s22 }
 0x23b   :  { %s360_s27 = sadd.f32 %s465_s24, %s337_s23  ;;  %s469_s28 = spop %468 }
 0x23c   :  { %436 = sst [smem:[#allocation2 + $0x1]] %s226_s25 }
 0x23d   :  { %s383_s29 = sadd.f32 %s467_s26, %s360_s27 }
 0x23f   :  { %s406_s30 = sadd.f32 %s469_s28, %s383_s29  ;;  %s471_s4 = spop %470 }
 0x241   :  { %s429_s5 = sadd.f32 %s471_s4, %s406_s30 }
 0x243   :  { %s432_s6 = smul.f32 0.010416667, %s429_s5 }
 0x245   :  { %438 = sst [smem:[#allocation2 + $0x2]] %s432_s6 }
 0x246   :  { %446 = dma.smem_to_hbm %s539_s7, 16, %s790_s3, [#allocation3]  }
 0x247   :  { %536 = dma.done.wait [#allocation3], 16  }
 0x248   :  { %537 = vsyncadd [#allocation3], 4294967280 }
 0x249   :  { %450 = sfence }
 0x24a   :  { %451 = vsyncpa [#allocation3], 1 }

</bundles_post_ra>
